<compile_context>
chip_gen: v7x
topology: tpu7x:2x2x1
jax: 0.10.0
libtpu: 0.0.40
codegen_flags: <defaults>
</compile_context>

<pallas_src>
import functools
import math

import numpy as np
import jax
import jax.numpy as jnp
from jax.experimental import pallas as pl
from jax.experimental.pallas import tpu as pltpu

# ----- hyperparameters consistent with the module's forward ------------------
INPUT_CHANNELS = 4
SEQ_LEN = 16
CONV_FILTERS = (8, 16)
CONV_KERNEL_SIZE = 3      # odd -> 'same' length conv, as in the module
POOL_SIZE = 2
LSTM_UNITS = 32
DENSE_UNITS = 16
BATCH = 2

# derived shorthands
K = CONV_KERNEL_SIZE
CIN = INPUT_CHANNELS
C1, C2 = CONV_FILTERS
H = LSTM_UNITS
DENSE = DENSE_UNITS
L = SEQ_LEN
L1 = L // POOL_SIZE           # time length after pool1 (8)
T = L1 // POOL_SIZE           # time length after pool2 == LSTM steps (4)
SLAB_COLS = 128               # lane width of the packed parameter slab


# --------------------------- slab layout helpers ------------------------------
def _align8(n):
    return ((n + 7) // 8) * 8


def _slab_layout(batch):
    """Row offsets of each parameter section inside the packed (rows,128) slab.
    Sections start on 8-row boundaries so every in-kernel load is tile aligned.
    whh / w1 / d1w sections are zero-row padded to 128 rows (see kernel)."""
    lay = {}
    off = 0
    for name, nrows in (
            ("wih", C2),                 # (C2, 4H)   LSTM input weights
            ("whh", 4 * H),              # (128, 4H)  recurrent weights, rows H:2H live
            ("bias", 5),                 # rows: blstm, c1b, c2b, d1b, d2b
            ("w1", SLAB_COLS),           # (128, C1)  conv1 im2col weight, rows 0:K*CIN live
            ("w2", C1),                  # (C1, K*C2) conv2 weight, taps [center|left|right]
            ("shift_dn", batch * L1),    # 0/1 matrix: picks the (b, t-1) neighbour
            ("shift_up", batch * L1),    # 0/1 matrix: picks the (b, t+1) neighbour
            ("d1w", 4 * H),              # (128, DENSE) dense-1 weight, rows H:2H live
            ("d2w", DENSE)):             # (DENSE, 1)
        lay[name] = off
        off = _align8(off + nrows)
    lay["total"] = off
    return lay


# ------------------------------ Pallas kernel --------------------------------
def cnn_lstm_kernel(xcol_ref, slab_ref, out_ref, *, lay):
    f32 = jnp.float32
    B = out_ref.shape[0]
    n1 = B * L1          # rows after pool1 (16)
    n2 = B * T           # rows after pool2 (8); row order = t*B + b

    def sig(x):          # sigmoid via a single tanh (one EUP pass)
        return 0.5 * jnp.tanh(0.5 * x) + 0.5

    # ---- conv1: single matmul on the lane-dense im2col matrix + ReLU --------
    # xcol is (B*L, 128); w1 rows beyond K*CIN are zero, so padding is free.
    w1 = slab_ref[lay["w1"]:lay["w1"] + SLAB_COLS, 0:C1]             # (128, C1)
    b1 = slab_ref[lay["bias"] + 1:lay["bias"] + 2, 0:C1]             # (1, C1)
    y1 = jnp.dot(xcol_ref[...], w1, preferred_element_type=f32) + b1
    y1 = jnp.maximum(y1, 0.0)                                        # (B*L, C1)

    # ---- maxpool1: rows pre-permuted -> max of contiguous aligned halves ----
    p1 = jnp.maximum(y1[0:n1, :], y1[n1:2 * n1, :])                  # (B*L1, C1)

    # ---- conv2: 1 matmul for all taps + two 0/1 shift matmuls + ReLU --------
    # w2 columns are ordered [center | left | right]: the directly-added
    # center slice z[:, 0:C2] is lane-aligned with the dot() results (lane 0).
    w2 = slab_ref[lay["w2"]:lay["w2"] + C1, 0:K * C2]                # (C1, K*C2)
    b2 = slab_ref[lay["bias"] + 2:lay["bias"] + 3, 0:C2]             # (1, C2)
    sd = slab_ref[lay["shift_dn"]:lay["shift_dn"] + n1, 0:n1]        # (n1, n1)
    su = slab_ref[lay["shift_up"]:lay["shift_up"] + n1, 0:n1]        # (n1, n1)
    z = jnp.dot(p1, w2, preferred_element_type=f32)                  # (n1, K*C2)
    y2 = (z[:, 0:C2]
          + jnp.dot(sd, z[:, C2:2 * C2], preferred_element_type=f32)
          + jnp.dot(su, z[:, 2 * C2:3 * C2], preferred_element_type=f32)
          + b2)
    y2 = jnp.maximum(y2, 0.0)                                        # (n1, C2)

    # ---- maxpool2 ------------------------------------------------------------
    p2 = jnp.maximum(y2[0:n2, :], y2[n2:2 * n2, :])                  # (B*T, C2)

    # ---- LSTM ----------------------------------------------------------------
    # Input projection hoisted out of the recurrence (one lane-dense matmul).
    wih = slab_ref[lay["wih"]:lay["wih"] + C2, :]                    # (C2, 4H)
    whh = slab_ref[lay["whh"]:lay["whh"] + 4 * H, :]                 # (128, 4H) rows H:2H live
    blstm = slab_ref[lay["bias"]:lay["bias"] + 1, :]                 # (1, 4H)
    gates_x = jnp.dot(p2, wih, preferred_element_type=f32) + blstm   # (B*T, 4H)

    # gate order along the 4H lanes: i | f | g | o (PyTorch order).
    lane = jax.lax.broadcasted_iota(jnp.int32, (B, 4 * H), 1)
    is_g = jnp.logical_and(lane >= 2 * H, lane < 3 * H)

    # h and c are kept as FULL 128-lane vregs; the live values sit in lanes
    # H:2H (the f/o block), so f*c and o*tanh(c) need no lane movement and the
    # recurrent / dense matmuls consume h directly via zero-row-padded weights.
    h_vec = jnp.zeros((B, 4 * H), f32)
    c_vec = jnp.zeros((B, 4 * H), f32)
    for t in range(T):   # T = 4, fully unrolled; only h_vec @ whh is sequential
        gates = gates_x[t * B:(t + 1) * B, :] + jnp.dot(
            h_vec, whh, preferred_element_type=f32)                  # (B, 4H)
        # single EUP pass: sigmoid(x) = 0.5*tanh(x/2) + 0.5, tanh for g lanes
        th = jnp.tanh(jnp.where(is_g, gates, 0.5 * gates))
        act = jnp.where(is_g, th, 0.5 * th + 0.5)        # [ i | f | g | o ]
        act_r = pltpu.roll(act, shift=2 * H, axis=1)     # [ g | o | i | f ]
        prod = act * act_r                               # [i*g|f*o|i*g|f*o]
        # lanes H:2H:  c_new = f*c_old + i*g   (i*g brought in by one roll)
        c_vec = act * c_vec + pltpu.roll(prod, shift=H, axis=1)
        tc = jnp.tanh(c_vec)
        # lanes H:2H:  h_new = o * tanh(c_new)   (o already at H:2H in act_r)
        h_vec = act_r * tc
    # h_vec lanes H:2H == lstm_out[:, -1, :]; other lanes are bounded garbage
    # that is annihilated by the zero rows of d1w below.

    # ---- dense head: Linear -> Sigmoid -> Linear -> Sigmoid -------------------
    d1w = slab_ref[lay["d1w"]:lay["d1w"] + 4 * H, 0:DENSE]           # rows H:2H live
    d1b = slab_ref[lay["bias"] + 3:lay["bias"] + 4, 0:DENSE]
    d2w = slab_ref[lay["d2w"]:lay["d2w"] + DENSE, 0:1]
    d2b = slab_ref[lay["bias"] + 4:lay["bias"] + 5, 0:1]
    d1 = sig(jnp.dot(h_vec, d1w, preferred_element_type=f32) + d1b)
    out = sig(jnp.dot(d1, d2w, preferred_element_type=f32) + d2b)
    out_ref[...] = out.astype(out_ref.dtype)


# ------------------------------- wrapper --------------------------------------
def _conv2_shift_mats(batch):
    """0/1 matrices realizing the +-1 conv2 taps on the permuted row order.
    p1 / y2 rows are ordered r = q*(batch*T) + s*batch + b with post-pool1
    time index t1 = 2*s + q (see _im2col_conv1)."""
    n = batch * L1
    row_of, info = {}, []
    for r in range(n):
        q, rem = divmod(r, batch * T)
        s, b = divmod(rem, batch)
        t1 = POOL_SIZE * s + q
        row_of[(b, t1)] = r
        info.append((b, t1))
    dn = np.zeros((n, n), np.float32)   # picks the (b, t1 - 1) neighbour
    up = np.zeros((n, n), np.float32)   # picks the (b, t1 + 1) neighbour
    for r, (b, t1) in enumerate(info):
        if t1 - 1 >= 0:
            dn[r, row_of[(b, t1 - 1)]] = 1.0
        if t1 + 1 < L1:
            up[r, row_of[(b, t1 + 1)]] = 1.0
    return jnp.asarray(dn), jnp.asarray(up)


def _im2col_conv1(x_ncl):
    """(B, Cin, L) -> permuted, lane-dense im2col matrix (B*L, 128).
    Row order ((p*2 + q)*T + s)*B + b with l = 4*s + 2*q + p, so that both
    MaxPool1d(2) stages inside the kernel reduce to max(top half, bottom half)
    of contiguous, 8-aligned row blocks.  Columns 12:128 are zero (they meet
    zero rows of the padded conv1 weight on the MXU -> free, but the DMA is a
    dense 16 KiB tile instead of a 12-of-128-lane strided descriptor)."""
    batch = x_ncl.shape[0]
    x = jnp.transpose(x_ncl, (0, 2, 1)).astype(jnp.float32)          # (B, L, Cin)
    pad = K // 2
    xp = jnp.pad(x, ((0, 0), (pad, pad), (0, 0)))                    # (B, L+2p, Cin)
    cols = [xp[:, j:j + L, :] for j in range(K)]
    xcol = jnp.concatenate(cols, axis=2)                             # (B, L, K*Cin)
    xcol = xcol.reshape(batch, T, POOL_SIZE, POOL_SIZE, K * CIN)     # (b,s,q,p,kc)
    xcol = jnp.transpose(xcol, (3, 2, 1, 0, 4))                      # (p,q,s,b,kc)
    xcol = xcol.reshape(batch * L, K * CIN)
    return jnp.pad(xcol, ((0, 0), (0, SLAB_COLS - K * CIN)))         # (B*L, 128)


def pack_params(params, batch):
    """Pack all weights/biases/helper matrices into one (rows, 128) f32 slab.
    Called ONCE per parameter set (outside the per-call path); the jitted
    forward only touches the tiny im2col op per call."""
    lay = _slab_layout(batch)
    slab = jnp.zeros((lay["total"], SLAB_COLS), jnp.float32)
    slab = slab.at[lay["wih"]:lay["wih"] + C2, :].set(params["wih"])
    # recurrent weights: rows H:2H live (h lives in lanes H:2H of h_vec)
    slab = slab.at[lay["whh"] + H:lay["whh"] + 2 * H, :].set(params["whh"])
    slab = slab.at[lay["bias"], :].set(params["blstm"][0])
    slab = slab.at[lay["bias"] + 1, 0:C1].set(params["c1b"][0])
    slab = slab.at[lay["bias"] + 2, 0:C2].set(params["c2b"][0])
    slab = slab.at[lay["bias"] + 3, 0:DENSE].set(params["d1b"][0])
    slab = slab.at[lay["bias"] + 4, 0:1].set(params["d2b"][0])
    # conv1 weight (K, CIN, C1) -> rows 0:K*CIN of a 128-row section, rows
    # ordered (k, c) to match the lane-dense im2col columns
    slab = slab.at[lay["w1"]:lay["w1"] + K * CIN, 0:C1].set(
        params["c1w"].reshape(K * CIN, C1))
    # conv2 weight: column blocks ordered [center | left | right] so the
    # directly-added center tap sits at lanes 0:C2 inside the kernel
    w2cat = jnp.concatenate(
        [params["c2w"][1], params["c2w"][0], params["c2w"][2]], axis=1)
    slab = slab.at[lay["w2"]:lay["w2"] + C1, 0:K * C2].set(w2cat)
    sd, su = _conv2_shift_mats(batch)
    n = batch * L1
    slab = slab.at[lay["shift_dn"]:lay["shift_dn"] + n, 0:n].set(sd)
    slab = slab.at[lay["shift_up"]:lay["shift_up"] + n, 0:n].set(su)
    # dense-1 weight: rows H:2H live, so h_vec feeds it without any slice
    slab = slab.at[lay["d1w"] + H:lay["d1w"] + 2 * H, 0:DENSE].set(params["d1w"])
    slab = slab.at[lay["d2w"]:lay["d2w"] + DENSE, 0:1].set(params["d2w"])
    return slab


@jax.jit
def cnn_lstm_forward(x_ncl, slab):
    """x_ncl: (B, C_in, L) float32 (PyTorch Conv1d layout); slab: pre-packed
    parameter slab from pack_params()."""
    # Static degenerate case from the module: cnn_out time dim == 0 -> 0.5s.
    if T <= 0:
        return jnp.full((x_ncl.shape[0], 1), 0.5, jnp.float32)
    batch = x_ncl.shape[0]
    lay = _slab_layout(batch)
    xcol = _im2col_conv1(x_ncl)                  # (B*L, 128) lane-dense
    vmem = pl.BlockSpec(memory_space=pltpu.MemorySpace.VMEM)
    # NOTE: gridless single-program call is right for B=2. For production
    # batch sizes on v7x add a grid over >=8-row batch blocks with
    # compiler_params=pltpu.CompilerParams(dimension_semantics=("parallel",))
    # so both TensorCores get work; stay gridless on v5e/v6e (1 TC).
    return pl.pallas_call(
        functools.partial(cnn_lstm_kernel, lay=lay),
        out_shape=jax.ShapeDtypeStruct((batch, 1), jnp.float32),
        in_specs=[vmem, vmem],
        out_specs=vmem,
    )(xcol, slab)


# -------------------------- deterministic params ------------------------------
def init_params(key):
    ks = jax.random.split(key, 12)

    def u(k, shape, fan_in):
        bound = 1.0 / math.sqrt(fan_in)
        return jax.random.uniform(k, shape, jnp.float32, -bound, bound)

    return {
        # conv weights stored as (K, Cin, Cout); biases as (1, Cout)
        "c1w": u(ks[0], (K, CIN, C1), CIN * K),
        "c1b": u(ks[1], (1, C1), CIN * K),
        "c2w": u(ks[2], (K, C1, C2), C1 * K),
        "c2b": u(ks[3], (1, C2), C1 * K),
        # LSTM weights pre-transposed: (F, 4H), (H, 4H); combined bias (1, 4H)
        # gate order along the 4H axis: i | f | g | o (PyTorch order)
        "wih": u(ks[4], (C2, 4 * H), H),
        "whh": u(ks[5], (H, 4 * H), H),
        "blstm": u(ks[6], (1, 4 * H), H) + u(ks[7], (1, 4 * H), H),
        # dense layers pre-transposed: (in, out); biases (1, out)
        "d1w": u(ks[8], (H, DENSE), H),
        "d1b": u(ks[9], (1, DENSE), H),
        "d2w": u(ks[10], (DENSE, 1), DENSE),
        "d2b": u(ks[11], (1, 1), DENSE),
    }


# ------------------------- pure-JAX reference ---------------------------------
def ref_forward(x_ncl, params):
    hi = jax.lax.Precision.HIGHEST
    x = jnp.transpose(x_ncl, (0, 2, 1)).astype(jnp.float32)

    def conv1d_same(x, w, b):
        B_, Lc, _ = x.shape
        Kc, _, Cout = w.shape
        pad = Kc // 2
        xp = jnp.pad(x, ((0, 0), (pad, pad), (0, 0)))
        y = jnp.zeros((B_, Lc, Cout), jnp.float32) + b.reshape(1, 1, Cout)
        for j in range(Kc):
            y = y + jnp.einsum("blc,co->blo", xp[:, j:j + Lc, :], w[j], precision=hi)
        return y

    def maxpool1d(x, p):
        B_, Lc, C = x.shape
        Lout = Lc // p
        return jnp.max(x[:, :Lout * p, :].reshape(B_, Lout, p, C), axis=2)

    h = jnp.maximum(conv1d_same(x, params["c1w"], params["c1b"]), 0.0)
    h = maxpool1d(h, POOL_SIZE)
    h = jnp.maximum(conv1d_same(h, params["c2w"], params["c2b"]), 0.0)
    h = maxpool1d(h, POOL_SIZE)

    B_, Tn, _ = h.shape
    h_t = jnp.zeros((B_, H), jnp.float32)
    c_t = jnp.zeros((B_, H), jnp.float32)
    for t in range(Tn):
        gates = (jnp.dot(h[:, t, :], params["wih"], precision=hi)
                 + jnp.dot(h_t, params["whh"], precision=hi)
                 + params["blstm"])
        i_g = jax.nn.sigmoid(gates[:, 0:H])
        f_g = jax.nn.sigmoid(gates[:, H:2 * H])
        g_g = jnp.tanh(gates[:, 2 * H:3 * H])
        o_g = jax.nn.sigmoid(gates[:, 3 * H:4 * H])
        c_t = f_g * c_t + i_g * g_g
        h_t = o_g * jnp.tanh(c_t)

    d1 = jax.nn.sigmoid(jnp.dot(h_t, params["d1w"], precision=hi) + params["d1b"])
    return jax.nn.sigmoid(jnp.dot(d1, params["d2w"], precision=hi) + params["d2b"])


# --------------------------------- main ---------------------------------------
if __name__ == "__main__":
    key = jax.random.PRNGKey(0)
    pkey, xkey = jax.random.split(key)
    params = init_params(pkey)
    x = jax.random.normal(xkey, (BATCH, CIN, L), jnp.float32)

    # Pack every weight / bias / helper matrix ONCE (outside the hot path).
    slab = jax.block_until_ready(pack_params(params, BATCH))

    out = jax.block_until_ready(cnn_lstm_forward(x, slab))
    assert out.shape == (BATCH, 1), out.shape
    assert bool(jnp.all(jnp.isfinite(out)))

    ref = jax.block_until_ready(ref_forward(x, params))
    assert bool(jnp.allclose(out, ref, atol=1e-2, rtol=1e-2)), (out, ref)

    print("KERNEL_OK")
</pallas_src>

<mosaic_0001>
module attributes {stable_mosaic.version = 11 : i64} {
  func.func @cnn_lstm_kernel(%arg0: memref<32x128xf32, #tpu.memory_space<vmem>>, %arg1: memref<464x128xf32, #tpu.memory_space<vmem>>, %arg2: memref<2x1xf32, #tpu.memory_space<vmem>>) attributes {dimension_semantics = [], scalar_prefetch = 0 : i64, scratch_operands = 0 : i64, tpu.core_type = #tpu.core_type<tc>} {
    %c152 = arith.constant 152 : index
    %c0 = arith.constant 0 : index
    %0 = vector.load %arg1[%c152, %c0] : memref<464x128xf32, #tpu.memory_space<vmem>>, vector<128x8xf32>
    %c145 = arith.constant 145 : index
    %c0_0 = arith.constant 0 : index
    %1 = vector.load %arg1[%c145, %c0_0] : memref<464x128xf32, #tpu.memory_space<vmem>>, vector<1x8xf32>
    %c0_1 = arith.constant 0 : index
    %c0_2 = arith.constant 0 : index
    %2 = vector.load %arg0[%c0_1, %c0_2] : memref<32x128xf32, #tpu.memory_space<vmem>>, vector<32x128xf32>
    %cst = arith.constant dense<0.000000e+00> : vector<32x8xf32>
    %3 = tpu.matmul %2, %0, %cst {dimension_numbers = #tpu.dot_dimension_numbers<[1], [0], [0], [1], [0, 0, 1, 1], [], []>} : vector<32x128xf32>, vector<128x8xf32>, vector<32x8xf32> -> vector<32x8xf32>
    %4 = vector.broadcast %1 : vector<1x8xf32> to vector<32x8xf32>
    %5 = arith.addf %3, %4 : vector<32x8xf32>
    %cst_3 = arith.constant 0.000000e+00 : f32
    %6 = vector.broadcast %cst_3 : f32 to vector<32x8xf32>
    %7 = arith.maximumf %5, %6 : vector<32x8xf32>
    %8 = vector.extract_strided_slice %7 {offsets = [0, 0], sizes = [16, 8], strides = [1, 1]} : vector<32x8xf32> to vector<16x8xf32>
    %9 = vector.extract_strided_slice %7 {offsets = [16, 0], sizes = [16, 8], strides = [1, 1]} : vector<32x8xf32> to vector<16x8xf32>
    %10 = arith.maximumf %8, %9 : vector<16x8xf32>
    %c280 = arith.constant 280 : index
    %c0_4 = arith.constant 0 : index
    %11 = vector.load %arg1[%c280, %c0_4] : memref<464x128xf32, #tpu.memory_space<vmem>>, vector<8x48xf32>
    %c146 = arith.constant 146 : index
    %c0_5 = arith.constant 0 : index
    %12 = vector.load %arg1[%c146, %c0_5] : memref<464x128xf32, #tpu.memory_space<vmem>>, vector<1x16xf32>
    %c288 = arith.constant 288 : index
    %c0_6 = arith.constant 0 : index
    %13 = vector.load %arg1[%c288, %c0_6] : memref<464x128xf32, #tpu.memory_space<vmem>>, vector<16x16xf32>
    %c304 = arith.constant 304 : index
    %c0_7 = arith.constant 0 : index
    %14 = vector.load %arg1[%c304, %c0_7] : memref<464x128xf32, #tpu.memory_space<vmem>>, vector<16x16xf32>
    %cst_8 = arith.constant dense<0.000000e+00> : vector<16x48xf32>
    %15 = tpu.matmul %10, %11, %cst_8 {dimension_numbers = #tpu.dot_dimension_numbers<[1], [0], [0], [1], [0, 0, 1, 1], [], []>} : vector<16x8xf32>, vector<8x48xf32>, vector<16x48xf32> -> vector<16x48xf32>
    %16 = vector.extract_strided_slice %15 {offsets = [0, 0], sizes = [16, 16], strides = [1, 1]} : vector<16x48xf32> to vector<16x16xf32>
    %17 = vector.extract_strided_slice %15 {offsets = [0, 16], sizes = [16, 16], strides = [1, 1]} : vector<16x48xf32> to vector<16x16xf32>
    %cst_9 = arith.constant dense<0.000000e+00> : vector<16x16xf32>
    %18 = tpu.matmul %13, %17, %cst_9 {dimension_numbers = #tpu.dot_dimension_numbers<[1], [0], [0], [1], [0, 0, 1, 1], [], []>} : vector<16x16xf32>, vector<16x16xf32>, vector<16x16xf32> -> vector<16x16xf32>
    %19 = arith.addf %16, %18 : vector<16x16xf32>
    %20 = vector.extract_strided_slice %15 {offsets = [0, 32], sizes = [16, 16], strides = [1, 1]} : vector<16x48xf32> to vector<16x16xf32>
    %cst_10 = arith.constant dense<0.000000e+00> : vector<16x16xf32>
    %21 = tpu.matmul %14, %20, %cst_10 {dimension_numbers = #tpu.dot_dimension_numbers<[1], [0], [0], [1], [0, 0, 1, 1], [], []>} : vector<16x16xf32>, vector<16x16xf32>, vector<16x16xf32> -> vector<16x16xf32>
    %22 = arith.addf %19, %21 : vector<16x16xf32>
    %23 = vector.broadcast %12 : vector<1x16xf32> to vector<16x16xf32>
    %24 = arith.addf %22, %23 : vector<16x16xf32>
    %cst_11 = arith.constant 0.000000e+00 : f32
    %25 = vector.broadcast %cst_11 : f32 to vector<16x16xf32>
    %26 = arith.maximumf %24, %25 : vector<16x16xf32>
    %27 = vector.extract_strided_slice %26 {offsets = [0, 0], sizes = [8, 16], strides = [1, 1]} : vector<16x16xf32> to vector<8x16xf32>
    %28 = vector.extract_strided_slice %26 {offsets = [8, 0], sizes = [8, 16], strides = [1, 1]} : vector<16x16xf32> to vector<8x16xf32>
    %29 = arith.maximumf %27, %28 : vector<8x16xf32>
    %c0_12 = arith.constant 0 : index
    %c0_13 = arith.constant 0 : index
    %30 = vector.load %arg1[%c0_12, %c0_13] : memref<464x128xf32, #tpu.memory_space<vmem>>, vector<16x128xf32>
    %c16 = arith.constant 16 : index
    %c0_14 = arith.constant 0 : index
    %31 = vector.load %arg1[%c16, %c0_14] : memref<464x128xf32, #tpu.memory_space<vmem>>, vector<128x128xf32>
    %c144 = arith.constant 144 : index
    %c0_15 = arith.constant 0 : index
    %32 = vector.load %arg1[%c144, %c0_15] : memref<464x128xf32, #tpu.memory_space<vmem>>, vector<1x128xf32>
    %cst_16 = arith.constant dense<0.000000e+00> : vector<8x128xf32>
    %33 = tpu.matmul %29, %30, %cst_16 {dimension_numbers = #tpu.dot_dimension_numbers<[1], [0], [0], [1], [0, 0, 1, 1], [], []>} : vector<8x16xf32>, vector<16x128xf32>, vector<8x128xf32> -> vector<8x128xf32>
    %34 = vector.broadcast %32 : vector<1x128xf32> to vector<8x128xf32>
    %35 = arith.addf %33, %34 : vector<8x128xf32>
    %36 = tpu.iota {dimensions = array<i32: 1>} : vector<2x128xi32>
    %c64_i32 = arith.constant 64 : i32
    %37 = vector.broadcast %c64_i32 : i32 to vector<2x128xi32>
    %38 = arith.cmpi sge, %36, %37 : vector<2x128xi32>
    %c96_i32 = arith.constant 96 : i32
    %39 = vector.broadcast %c96_i32 : i32 to vector<2x128xi32>
    %40 = arith.cmpi slt, %36, %39 : vector<2x128xi32>
    %41 = arith.andi %38, %40 : vector<2x128xi1>
    %cst_17 = arith.constant 0.000000e+00 : f32
    %42 = vector.broadcast %cst_17 : f32 to vector<2x128xf32>
    %cst_18 = arith.constant 0.000000e+00 : f32
    %43 = vector.broadcast %cst_18 : f32 to vector<2x128xf32>
    %44 = vector.extract_strided_slice %35 {offsets = [0, 0], sizes = [2, 128], strides = [1, 1]} : vector<8x128xf32> to vector<2x128xf32>
    %cst_19 = arith.constant dense<0.000000e+00> : vector<2x128xf32>
    %45 = tpu.matmul %42, %31, %cst_19 {dimension_numbers = #tpu.dot_dimension_numbers<[1], [0], [0], [1], [0, 0, 1, 1], [], []>} : vector<2x128xf32>, vector<128x128xf32>, vector<2x128xf32> -> vector<2x128xf32>
    %46 = arith.addf %44, %45 : vector<2x128xf32>
    %cst_20 = arith.constant 5.000000e-01 : f32
    %47 = vector.broadcast %cst_20 : f32 to vector<2x128xf32>
    %48 = arith.mulf %47, %46 : vector<2x128xf32>
    %49 = arith.select %41, %46, %48 : vector<2x128xi1>, vector<2x128xf32>
    %50 = math.tanh %49 : vector<2x128xf32>
    %cst_21 = arith.constant 5.000000e-01 : f32
    %51 = vector.broadcast %cst_21 : f32 to vector<2x128xf32>
    %52 = arith.mulf %51, %50 : vector<2x128xf32>
    %cst_22 = arith.constant 5.000000e-01 : f32
    %53 = vector.broadcast %cst_22 : f32 to vector<2x128xf32>
    %54 = arith.addf %52, %53 : vector<2x128xf32>
    %55 = arith.select %41, %50, %54 : vector<2x128xi1>, vector<2x128xf32>
    %c64_i32_23 = arith.constant 64 : i32
    %56 = tpu.dynamic_rotate %55 by %c64_i32_23 dim 1 : vector<2x128xf32>, i32 -> vector<2x128xf32>
    %57 = arith.mulf %55, %56 : vector<2x128xf32>
    %58 = arith.mulf %55, %43 : vector<2x128xf32>
    %c32_i32 = arith.constant 32 : i32
    %59 = tpu.dynamic_rotate %57 by %c32_i32 dim 1 : vector<2x128xf32>, i32 -> vector<2x128xf32>
    %60 = arith.addf %58, %59 : vector<2x128xf32>
    %61 = math.tanh %60 : vector<2x128xf32>
    %62 = arith.mulf %56, %61 : vector<2x128xf32>
    %63 = vector.extract_strided_slice %35 {offsets = [2, 0], sizes = [2, 128], strides = [1, 1]} : vector<8x128xf32> to vector<2x128xf32>
    %cst_24 = arith.constant dense<0.000000e+00> : vector<2x128xf32>
    %64 = tpu.matmul %62, %31, %cst_24 {dimension_numbers = #tpu.dot_dimension_numbers<[1], [0], [0], [1], [0, 0, 1, 1], [], []>} : vector<2x128xf32>, vector<128x128xf32>, vector<2x128xf32> -> vector<2x128xf32>
    %65 = arith.addf %63, %64 : vector<2x128xf32>
    %cst_25 = arith.constant 5.000000e-01 : f32
    %66 = vector.broadcast %cst_25 : f32 to vector<2x128xf32>
    %67 = arith.mulf %66, %65 : vector<2x128xf32>
    %68 = arith.select %41, %65, %67 : vector<2x128xi1>, vector<2x128xf32>
    %69 = math.tanh %68 : vector<2x128xf32>
    %cst_26 = arith.constant 5.000000e-01 : f32
    %70 = vector.broadcast %cst_26 : f32 to vector<2x128xf32>
    %71 = arith.mulf %70, %69 : vector<2x128xf32>
    %cst_27 = arith.constant 5.000000e-01 : f32
    %72 = vector.broadcast %cst_27 : f32 to vector<2x128xf32>
    %73 = arith.addf %71, %72 : vector<2x128xf32>
    %74 = arith.select %41, %69, %73 : vector<2x128xi1>, vector<2x128xf32>
    %c64_i32_28 = arith.constant 64 : i32
    %75 = tpu.dynamic_rotate %74 by %c64_i32_28 dim 1 : vector<2x128xf32>, i32 -> vector<2x128xf32>
    %76 = arith.mulf %74, %75 : vector<2x128xf32>
    %77 = arith.mulf %74, %60 : vector<2x128xf32>
    %c32_i32_29 = arith.constant 32 : i32
    %78 = tpu.dynamic_rotate %76 by %c32_i32_29 dim 1 : vector<2x128xf32>, i32 -> vector<2x128xf32>
    %79 = arith.addf %77, %78 : vector<2x128xf32>
    %80 = math.tanh %79 : vector<2x128xf32>
    %81 = arith.mulf %75, %80 : vector<2x128xf32>
    %82 = vector.extract_strided_slice %35 {offsets = [4, 0], sizes = [2, 128], strides = [1, 1]} : vector<8x128xf32> to vector<2x128xf32>
    %cst_30 = arith.constant dense<0.000000e+00> : vector<2x128xf32>
    %83 = tpu.matmul %81, %31, %cst_30 {dimension_numbers = #tpu.dot_dimension_numbers<[1], [0], [0], [1], [0, 0, 1, 1], [], []>} : vector<2x128xf32>, vector<128x128xf32>, vector<2x128xf32> -> vector<2x128xf32>
    %84 = arith.addf %82, %83 : vector<2x128xf32>
    %cst_31 = arith.constant 5.000000e-01 : f32
    %85 = vector.broadcast %cst_31 : f32 to vector<2x128xf32>
    %86 = arith.mulf %85, %84 : vector<2x128xf32>
    %87 = arith.select %41, %84, %86 : vector<2x128xi1>, vector<2x128xf32>
    %88 = math.tanh %87 : vector<2x128xf32>
    %cst_32 = arith.constant 5.000000e-01 : f32
    %89 = vector.broadcast %cst_32 : f32 to vector<2x128xf32>
    %90 = arith.mulf %89, %88 : vector<2x128xf32>
    %cst_33 = arith.constant 5.000000e-01 : f32
    %91 = vector.broadcast %cst_33 : f32 to vector<2x128xf32>
    %92 = arith.addf %90, %91 : vector<2x128xf32>
    %93 = arith.select %41, %88, %92 : vector<2x128xi1>, vector<2x128xf32>
    %c64_i32_34 = arith.constant 64 : i32
    %94 = tpu.dynamic_rotate %93 by %c64_i32_34 dim 1 : vector<2x128xf32>, i32 -> vector<2x128xf32>
    %95 = arith.mulf %93, %94 : vector<2x128xf32>
    %96 = arith.mulf %93, %79 : vector<2x128xf32>
    %c32_i32_35 = arith.constant 32 : i32
    %97 = tpu.dynamic_rotate %95 by %c32_i32_35 dim 1 : vector<2x128xf32>, i32 -> vector<2x128xf32>
    %98 = arith.addf %96, %97 : vector<2x128xf32>
    %99 = math.tanh %98 : vector<2x128xf32>
    %100 = arith.mulf %94, %99 : vector<2x128xf32>
    %101 = vector.extract_strided_slice %35 {offsets = [6, 0], sizes = [2, 128], strides = [1, 1]} : vector<8x128xf32> to vector<2x128xf32>
    %cst_36 = arith.constant dense<0.000000e+00> : vector<2x128xf32>
    %102 = tpu.matmul %100, %31, %cst_36 {dimension_numbers = #tpu.dot_dimension_numbers<[1], [0], [0], [1], [0, 0, 1, 1], [], []>} : vector<2x128xf32>, vector<128x128xf32>, vector<2x128xf32> -> vector<2x128xf32>
    %103 = arith.addf %101, %102 : vector<2x128xf32>
    %cst_37 = arith.constant 5.000000e-01 : f32
    %104 = vector.broadcast %cst_37 : f32 to vector<2x128xf32>
    %105 = arith.mulf %104, %103 : vector<2x128xf32>
    %106 = arith.select %41, %103, %105 : vector<2x128xi1>, vector<2x128xf32>
    %107 = math.tanh %106 : vector<2x128xf32>
    %cst_38 = arith.constant 5.000000e-01 : f32
    %108 = vector.broadcast %cst_38 : f32 to vector<2x128xf32>
    %109 = arith.mulf %108, %107 : vector<2x128xf32>
    %cst_39 = arith.constant 5.000000e-01 : f32
    %110 = vector.broadcast %cst_39 : f32 to vector<2x128xf32>
    %111 = arith.addf %109, %110 : vector<2x128xf32>
    %112 = arith.select %41, %107, %111 : vector<2x128xi1>, vector<2x128xf32>
    %c64_i32_40 = arith.constant 64 : i32
    %113 = tpu.dynamic_rotate %112 by %c64_i32_40 dim 1 : vector<2x128xf32>, i32 -> vector<2x128xf32>
    %114 = arith.mulf %112, %113 : vector<2x128xf32>
    %115 = arith.mulf %112, %98 : vector<2x128xf32>
    %c32_i32_41 = arith.constant 32 : i32
    %116 = tpu.dynamic_rotate %114 by %c32_i32_41 dim 1 : vector<2x128xf32>, i32 -> vector<2x128xf32>
    %117 = arith.addf %115, %116 : vector<2x128xf32>
    %118 = math.tanh %117 : vector<2x128xf32>
    %119 = arith.mulf %113, %118 : vector<2x128xf32>
    %c320 = arith.constant 320 : index
    %c0_42 = arith.constant 0 : index
    %120 = vector.load %arg1[%c320, %c0_42] : memref<464x128xf32, #tpu.memory_space<vmem>>, vector<128x16xf32>
    %c147 = arith.constant 147 : index
    %c0_43 = arith.constant 0 : index
    %121 = vector.load %arg1[%c147, %c0_43] : memref<464x128xf32, #tpu.memory_space<vmem>>, vector<1x16xf32>
    %c448 = arith.constant 448 : index
    %c0_44 = arith.constant 0 : index
    %122 = vector.load %arg1[%c448, %c0_44] : memref<464x128xf32, #tpu.memory_space<vmem>>, vector<16x1xf32>
    %c148 = arith.constant 148 : index
    %c0_45 = arith.constant 0 : index
    %123 = vector.load %arg1[%c148, %c0_45] : memref<464x128xf32, #tpu.memory_space<vmem>>, vector<1x1xf32>
    %cst_46 = arith.constant dense<0.000000e+00> : vector<2x16xf32>
    %124 = tpu.matmul %119, %120, %cst_46 {dimension_numbers = #tpu.dot_dimension_numbers<[1], [0], [0], [1], [0, 0, 1, 1], [], []>} : vector<2x128xf32>, vector<128x16xf32>, vector<2x16xf32> -> vector<2x16xf32>
    %125 = vector.broadcast %121 : vector<1x16xf32> to vector<2x16xf32>
    %126 = arith.addf %124, %125 : vector<2x16xf32>
    %cst_47 = arith.constant 5.000000e-01 : f32
    %127 = vector.broadcast %cst_47 : f32 to vector<2x16xf32>
    %128 = arith.mulf %127, %126 : vector<2x16xf32>
    %129 = math.tanh %128 : vector<2x16xf32>
    %cst_48 = arith.constant 5.000000e-01 : f32
    %130 = vector.broadcast %cst_48 : f32 to vector<2x16xf32>
    %131 = arith.mulf %130, %129 : vector<2x16xf32>
    %cst_49 = arith.constant 5.000000e-01 : f32
    %132 = vector.broadcast %cst_49 : f32 to vector<2x16xf32>
    %133 = arith.addf %131, %132 : vector<2x16xf32>
    %cst_50 = arith.constant dense<0.000000e+00> : vector<2x1xf32>
    %134 = tpu.matmul %133, %122, %cst_50 {dimension_numbers = #tpu.dot_dimension_numbers<[1], [0], [0], [1], [0, 0, 1, 1], [], []>} : vector<2x16xf32>, vector<16x1xf32>, vector<2x1xf32> -> vector<2x1xf32>
    %135 = vector.broadcast %123 : vector<1x1xf32> to vector<2x1xf32>
    %136 = arith.addf %134, %135 : vector<2x1xf32>
    %cst_51 = arith.constant 5.000000e-01 : f32
    %137 = vector.broadcast %cst_51 : f32 to vector<2x1xf32>
    %138 = arith.mulf %137, %136 : vector<2x1xf32>
    %139 = math.tanh %138 : vector<2x1xf32>
    %cst_52 = arith.constant 5.000000e-01 : f32
    %140 = vector.broadcast %cst_52 : f32 to vector<2x1xf32>
    %141 = arith.mulf %140, %139 : vector<2x1xf32>
    %cst_53 = arith.constant 5.000000e-01 : f32
    %142 = vector.broadcast %cst_53 : f32 to vector<2x1xf32>
    %143 = arith.addf %141, %142 : vector<2x1xf32>
    %c0_54 = arith.constant 0 : index
    %c0_55 = arith.constant 0 : index
    %144 = vector.load %arg2[%c0_54, %c0_55] : memref<2x1xf32, #tpu.memory_space<vmem>>, vector<2x1xf32>
    tpu.vector_store %arg2[%c0_54, %c0_55], %143 {strides = array<i32>} : memref<2x1xf32, #tpu.memory_space<vmem>>, vector<2x1xf32>,
    return
  }
}

</mosaic_0001>

<bundles_post_ra>
// kernel: cnn_lstm_forward.1
= control target key start
LH: loop header
LB: loop body
LE: loop exit
PB: predicated region body
PF: predicated region fallthrough
CT: control target
= control target key end

     0   :  { %7 = vsyncpa [#allocation3], 0  ;;  %s1728_s9 = smov [#allocation2]   ;;  %s1937_s0 = inlined_call_operand.vmem [shape: f32[32,128], index: 0, kind: input, shape index: {}]   ;;  %s1938_s1 = inlined_call_operand.hbm [shape: f32[464,128], index: 1, kind: input, shape index: {}]   ;;  %s1939_s2 = inlined_call_operand.vmem [shape: f32[2,1], index: 2, kind: output, shape index: {}]  }
   0x1   :  { %s15_s10 = sshll.u32 %s1728_s9, 4  ;;  %s1704_s13 = scalar_lea.hbm %s1938_s1, 7424  ;;  %s16_s10 = int_to_ptr.vmem [resolvable:$true] %s15_s10 }
   0x2   :  { %p1705_p0 = scmp.ne.s32.totalorder %s1938_s1, %s1704_s13  ;;  %p1708_p1 = scmp.lt.u32.totalorder %s1704_s13, %s1938_s1 }
   0x4   :  { %p1710_p2 = pnand %p1708_p1, %p1705_p0 }
   0x6   :  { %1713 = shalt.err (!%p1710_p2)
}
   0x7   :  { %s1714_s18 = scalar_lea.vmem %s16_s10, 7424  ;;  %p1719_p4 = scmp.lt.s32.totalorder %s16_s10, %s16_s10 }
   0x8   :  { %p1715_p3 = scmp.ne.s32.totalorder %s16_s10, %s1714_s18  ;;  %p1720_p5 = scmp.lt.s32.totalorder %s1714_s18, %s1714_s18 }
   0xa   :  { %p1721_p6 = por %p1720_p5, %p1719_p4 }
   0xc   :  { %p1722_p7 = pnand %p1721_p6, %p1715_p3 }
   0xe   :  { %1725 = shalt.err (!%p1722_p7)
}
   0xf   :  { %s1729_s19 = smov 128   ;;  %s1730_s20 = smov 8  }
  0x10   :  { %21 = dma.hbm_to_vmem [thread:$0]  %s1938_s1, 7424, %s16_s10, [#allocation3], %s1729_s19, %s1729_s19, %s1730_s20  }
  0x11   :  { %1726 = dma.done.wait [#allocation3], 7424  }
  0x12   :  { %1727 = vsyncadd [#allocation3], 4294959872  ;;  %v25_v0 = vld [vmem:[#allocation2 + $0x98] sm:$0xff]  ;;  %v26_v1 = vld [vmem:[#allocation2 + $0xa0] sm:$0xff]  ;;  %vm147_vm0 = vcmask 64512   ;;  %vm237_vm1 = vcmask 130048  }
  0x13   :  { %v27_v2 = vld [vmem:[#allocation2 + $0xa8] sm:$0xff]  ;;  %v1494_v3 = vpack.c.bf16 %v26_v1, %v25_v0  ;;  %v28_v4 = vld [vmem:[#allocation2 + $0xb0] sm:$0xff]  ;;  %v29_v6 = vld [vmem:[#allocation2 + $0xb8] sm:$0xff]  ;;  %s1732_s30 = smov 96   ;;  %v1733_v62 = vmov 0.0|0.0   ;;  %vm1734_vm2 = vmmov 0  }
  0x14   :  { %v1498_v5 = vpack.c.bf16 %v28_v4, %v27_v2  ;;  %v30_v7 = vld [vmem:[#allocation2 + $0xc0] sm:$0xff]  ;;  %v31_v10 = vld [vmem:[#allocation2 + $0xc8] sm:$0xff]  ;;  %v32_v11 = vld [vmem:[#allocation2 + $0xd0] sm:$0xff]  ;;  %v1735_v2 = vmov 0.0   ;;  %s1736_s3 = smov 64   ;;  %s1737_s4 = smov 32  }
  0x15   :  { %1495 = vmatprep.subr.bf16.mxu0 %v1494_v3  ;;  %v1502_v8 = vpack.c.bf16 %v30_v7, %v29_v6  ;;  %v42_v9 = vld [vmem:[%s1937_s0] sm:$0xff]  ;;  %v1506_v12 = vpack.c.bf16 %v32_v11, %v31_v10  ;;  %v33_v13 = vld [vmem:[#allocation2 + $0xd8] sm:$0xff]  ;;  %v35_v16 = vld [vmem:[#allocation2 + $0xe8] sm:$0xff]  ;;  %vm1106_vm6 = vcmask 1024  }
  0x16   :  { %1497 = vmatpush3.bf16.msra.mxu0 %v1494_v3  ;;  %1280 = vmatprep.mubr.f32.mxu0 %v42_v9  ;;  %v34_v14 = vld [vmem:[#allocation2 + $0xe0] sm:$0xff]  ;;  %v36_v17 = vld [vmem:[#allocation2 + $0xf0] sm:$0xff]  ;;  %v37_v19 = vld [vmem:[#allocation2 + $0xf8] sm:$0xff] }
  0x17   :  { %1499 = vmatprep.subr.bf16.mxu0 %v1498_v5  ;;  %v1510_v15 = vpack.c.bf16 %v34_v14, %v33_v13  ;;  %v1514_v18 = vpack.c.bf16 %v36_v17, %v35_v16  ;;  %v38_v20 = vld [vmem:[#allocation2 + $0x100] sm:$0xff]  ;;  %v39_v22 = vld [vmem:[#allocation2 + $0x108] sm:$0xff]  ;;  %v40_v23 = vld [vmem:[#allocation2 + $0x110] sm:$0xff] }
  0x18   :  { %v1518_v21 = vpack.c.bf16 %v38_v20, %v37_v19  ;;  %v1522_v24 = vpack.c.bf16 %v40_v23, %v39_v22  ;;  %v43_v25 = vld [vmem:[%s1937_s0 + $0x8] sm:$0xff]  ;;  %v44_v26 = vld [vmem:[%s1937_s0 + $0x10] sm:$0xff]  ;;  %v45_v27 = vld [vmem:[%s1937_s0 + $0x18] sm:$0xff]  ;;  %s1731_s0 = smov 112  }
  0x19   :  { %v141_v28 = vld [vmem:[#allocation2 + $0x118] sm:$0xff]  ;;  %v1113_v30 = vld [vmem:[#allocation2 + $0x91] ss:$0 sm:$0xff]  ;;  %v143_v44 = vld [vmem:[#allocation2 + $0x120] sm:$0xff] }
  0x1a   :  { %1501 = vmatpush3.bf16.msra.mxu0 %v1498_v5  ;;  %1295 = vmatprep.mubr.msk.f32.mxu1 %vm237_vm1, %v143_v44  ;;  %v144_v55 = vld [vmem:[#allocation2 + $0x128] sm:$0xff]  ;;  %v145_v57 = vld [vmem:[#allocation2 + $0x130] sm:$0xff]  ;;  %v146_v58 = vld [vmem:[#allocation2 + $0x138] sm:$0xff] }
  0x1b   :  { %1503 = vmatprep.subr.bf16.mxu0 %v1502_v8  ;;  %v419_v59 = vld [vmem:[#allocation2] sm:$0xff]  ;;  %v420_v60 = vld [vmem:[#allocation2 + $0x8] sm:$0xff]  ;;  %v421_v63 = vld [vmem:[#allocation2 + $0x10] sm:$0xff] }
  0x1c   :  { %v1535_v61 = vpack.c.bf16 %v420_v60, %v419_v59  ;;  %v422_v0 = vld [vmem:[#allocation2 + $0x18] sm:$0xff]  ;;  %v423_v3 = vld [vmem:[#allocation2 + $0x20] sm:$0xff]  ;;  %v424_v4 = vld [vmem:[#allocation2 + $0x28] sm:$0xff] }
  0x1d   :  { %v1790_v1 = vpack.c.bf16 %v422_v0, %v421_v63  ;;  %v1798_v5 = vpack.c.bf16 %v424_v4, %v423_v3  ;;  %v425_v6 = vld [vmem:[#allocation2 + $0x30] sm:$0xff]  ;;  %v426_v7 = vld [vmem:[#allocation2 + $0x38] sm:$0xff]  ;;  %v427_v9 = vld [vmem:[#allocation2 + $0x40] sm:$0xff] }
  0x1e   :  { %1505 = vmatpush3.bf16.msra.mxu0 %v1502_v8  ;;  %v1802_v8 = vpack.c.bf16 %v426_v7, %v425_v6  ;;  %v428_v10 = vld [vmem:[#allocation2 + $0x48] sm:$0xff]  ;;  %v430_v13 = vld [vmem:[#allocation2 + $0x58] sm:$0xff] }
  0x1f   :  { %1507 = vmatprep.subr.bf16.mxu0 %v1506_v12  ;;  %v1806_v11 = vpack.c.bf16 %v428_v10, %v427_v9  ;;  %v432_v16 = vld [vmem:[#allocation2 + $0x68] sm:$0xff]  ;;  %v434_v19 = vld [vmem:[#allocation2 + $0x78] sm:$0xff] }
  0x20   :  { %v436_v22 = vld [vmem:[#allocation2 + $0x88] sm:$0xff] }
  0x22   :  { %1509 = vmatpush3.bf16.msra.mxu0 %v1506_v12  ;;  %v429_v12 = vld [vmem:[#allocation2 + $0x50] sm:$0xff] }
  0x23   :  { %1511 = vmatprep.subr.bf16.mxu0 %v1510_v15  ;;  %v1810_v14 = vpack.c.bf16 %v430_v13, %v429_v12 }
  0x26   :  { %1513 = vmatpush3.bf16.msra.mxu0 %v1510_v15  ;;  %v431_v15 = vld [vmem:[#allocation2 + $0x60] sm:$0xff] }
  0x27   :  { %1515 = vmatprep.subr.bf16.mxu0 %v1514_v18  ;;  %v1814_v17 = vpack.c.bf16 %v432_v16, %v431_v15 }
  0x2a   :  { %1517 = vmatpush3.bf16.msra.mxu0 %v1514_v18  ;;  %v433_v18 = vld [vmem:[#allocation2 + $0x70] sm:$0xff] }
  0x2b   :  { %1519 = vmatprep.subr.bf16.mxu0 %v1518_v21  ;;  %v1818_v20 = vpack.c.bf16 %v434_v19, %v433_v18 }
  0x2e   :  { %1521 = vmatpush3.bf16.msra.mxu0 %v1518_v21  ;;  %v435_v21 = vld [vmem:[#allocation2 + $0x80] sm:$0xff] }
  0x2f   :  { %1523 = vmatprep.subr.bf16.mxu0 %v1522_v24  ;;  %v1822_v23 = vpack.c.bf16 %v436_v22, %v435_v21 }
  0x32   :  { %1525 = vmatpush3.bf16.msra.mxu0 %v1522_v24  ;;  %v1120_v24 = vld [vmem:[#allocation2 + $0x92] ss:$0 sm:$0xff] }
  0x33   :  { %1286 = vmatprep.subr.mxu0 %v141_v28 }
  0x35   :  { %1281 = vmatmul.mubr.f32.vlgmr.msra.gmra.mrb[0].mxu0 %v43_v25 }
  0x36   :  { %1283 = vmatprep.mubr.f32.mxu0 %v44_v26  ;;  %1287 = vmatpush3.msra.mxu0 %v141_v28 }
  0x37   :  { %1561 = vmatprep.subr.bf16.mxu0 %v1733_v62 }
  0x39   :  { %1284 = vmatmul.mubr.f32.gmra.mrb[2].mxu0 %v45_v27 }
 0x108   :  { %v1282_v29 = vpop.f32.mrb[0].mxu0 }
 0x109   :  { %v116_v31 = vpop.f32.mrb[1].mxu0  ;;  %v122_v32 = vadd.f32 %v1282_v29, %v1113_v30 }
 0x10a   :  { %v117_v33 = vadd.f32 %v1113_v30, %v116_v31 }
 0x10b   :  { %v136_v38 = vmax.f32 %v122_v32, 0.0 }
 0x10c   :  { %v1285_v34 = vpop.f32.mrb[2].mxu0  ;;  %v135_v40 = vmax.f32 %v117_v33, 0.0 }
 0x10d   :  { %v132_v35 = vadd.f32 %v1285_v34, %v1113_v30  ;;  %v126_v36 = vpop.f32.mrb[3].mxu0 }
 0x10e   :  { %v127_v37 = vadd.f32 %v1113_v30, %v126_v36  ;;  %v515_v36 = vlaneseq }
 0x10f   :  { %v138_v39 = vmax.f32 %v132_v35, 0.0 }
 0x110   :  { %v137_v41 = vmax.f32 %v127_v37, 0.0  ;;  %v516_v37 = vand.u32 127, %v515_v36 }
 0x111   :  { %v140_v42 = vmax.f32 %v136_v38, %v138_v39  ;;  %v1121_v38 = vld [vmem:[#allocation2 + $0x90] ss:$0 sm:$0xff] }
 0x112   :  { %v139_v43 = vmax.f32 %v135_v40, %v137_v41  ;;  %vm517_vm3 = vcmp.ge.s32.totalorder %v516_v37, 64  ;;  %vm518_vm4 = vcmp.lt.s32.totalorder %v516_v37, 96 }
 0x113   :  { %vm1869_vm5 = vmand %vm517_vm3, %vm518_vm4 }
 0x114   :  { %1288 = vmatprep.mubr.msk.f32.mxu0 %vm147_vm0, %v139_v43  ;;  %v935_v43 = vld [vmem:[#allocation2 + $0x180] sm:$0xff] }
 0x115   :  { %1289 = vmatmul.mubr.msk.f32.vlgmr.msra.gmra.mrb[4].mxu0 %vm147_vm0, %v140_v42 }
 0x116   :  { %1379 = vmatprep.mubr.msk.f32.mxu0 %vm1734_vm2, %v1735_v2  ;;  %1563 = vmatpush3.bf16.msra.mxu0 %v1790_v1 }
 0x117   :  { %1564 = vmatprep.subr.bf16.mxu0 %v1733_v62 }
 0x11a   :  { %1566 = vmatpush3.bf16.msra.mxu0 %v1798_v5 }
 0x11b   :  { %1567 = vmatprep.subr.bf16.mxu0 %v1733_v62 }
 0x11e   :  { %1569 = vmatpush3.bf16.msra.mxu0 %v1802_v8 }
 0x11f   :  { %1570 = vmatprep.subr.bf16.mxu0 %v1733_v62 }
 0x122   :  { %1572 = vmatpush3.bf16.msra.mxu0 %v1806_v11 }
 0x123   :  { %1573 = vmatprep.subr.bf16.mxu0 %v1733_v62 }
 0x126   :  { %1575 = vmatpush3.bf16.msra.mxu0 %v1810_v14 }
 0x127   :  { %1576 = vmatprep.subr.bf16.mxu0 %v1733_v62 }
 0x12a   :  { %1578 = vmatpush3.bf16.msra.mxu0 %v1814_v17 }
 0x12b   :  { %1579 = vmatprep.subr.bf16.mxu0 %v1733_v62 }
 0x12e   :  { %1581 = vmatpush3.bf16.msra.mxu0 %v1818_v20 }
 0x12f   :  { %1582 = vmatprep.subr.bf16.mxu0 %v1733_v62 }
 0x132   :  { %1584 = vmatpush3.bf16.msra.mxu0 %v1822_v23 }
 0x133   :  { %1609 = vmatprep.subr.bf16.mxu0 %v1733_v62 }
 0x1e8   :  { %v1778_v45 = vpop.f32.mrb[4].mxu0 }
 0x1e9   :  { %v1780_v46 = vpop.f32.mrb[5].mxu0 }
 0x1ea   :  { %v1679_v47 = vpack.i.bf16 %v1778_v45, %v1780_v46 }
 0x1ec   :  { %1675 = vrot.lane.b32.xlu0 %v1679_v47, %s1731_s0 }
 0x1f0   :  { %1680 = vrot.lane.b32.xlu0 %v1679_v47, %s1732_s30 }
 0x25e   :  { %v1676_v48 = vpop.permute.xlu0 %1675 }
 0x25f   :  { %v1678_v49 = vunpack.i.h.bf16 %v1676_v48  ;;  %v1677_v50 = vunpack.i.l.bf16 %v1676_v48 }
 0x261   :  { %v1526_v51 = vpack.c.bf16 %v1678_v49, %v1677_v50 }
 0x262   :  { %v1681_v52 = vpop.permute.xlu0 %1680 }
 0x263   :  { %v1683_v53 = vunpack.i.h.bf16 %v1681_v52  ;;  %v1682_v54 = vunpack.i.l.bf16 %v1681_v52  ;;  %1527 = vmatprep.subr.bf16.mxu1 %v1526_v51 }
 0x264   :  { %1529 = vmatpush3.bf16.msra.mxu1 %v1526_v51 }
 0x265   :  { %v1530_v56 = vpack.c.bf16 %v1683_v53, %v1682_v54 }
 0x267   :  { %1296 = vmatmul.mubr.msk.f32.vlgmr.msra.gmra.mrb[0].mxu1 %vm237_vm1, %v144_v55  ;;  %1531 = vmatprep.subr.bf16.mxu1 %v1530_v56 }
 0x268   :  { %1533 = vmatpush3.bf16.msra.mxu1 %v1530_v56  ;;  %1302 = vmatprep.mubr.msk.f32.mxu1 %vm237_vm1, %v145_v57 }
 0x269   :  { %1534 = vmatprep.subr.bf16.mxu1 %v1733_v62 }
 0x26f   :  { %1303 = vmatmul.mubr.msk.f32.vlgmr.msra.gmra.mrb[0].mxu1 %vm237_vm1, %v146_v58 }
 0x270   :  { %1536 = vmatpush3.bf16.msra.mxu1 %v1535_v61  ;;  %1309 = vmatprep.mubr.msk.f32.mxu1 %vm1734_vm2, %v1735_v2 }
 0x271   :  { %1537 = vmatprep.subr.bf16.mxu1 %v1733_v62 }
 0x342   :  { %v1304_v25 = vpop.f32.mrb[0].mxu1 }
 0x343   :  { %v1660_v26 = vadd.f32 %v1304_v25, %v1778_v45  ;;  %v399_v27 = vpop.f32.mrb[1].mxu1 }
 0x344   :  { %v1661_v28 = vadd.f32 %v399_v27, %v1780_v46 }
 0x345   :  { %v415_v29 = vadd.f32 %v1660_v26, %v1120_v24 }
 0x346   :  { %v414_v30 = vadd.f32 %v1661_v28, %v1120_v24 }
 0x347   :  { %v417_v31 = vmax.f32 %v415_v29, 0.0 }
 0x348   :  { %v416_v32 = vmax.f32 %v414_v30, 0.0 }
 0x34a   :  { %v418_v33 = vmax.f32 %v416_v32, %v417_v31 }
 0x34c   :  { %1310 = vmatmul.mubr.msk.f32.vlgmr.msra.gmra.mrb[2].mxu1 %vm237_vm1, %v418_v33 }
 0x34d   :  { %1539 = vmatpush3.bf16.msra.mxu1 %v1790_v1  ;;  %1344 = vmatprep.mubr.msk.f32.mxu1 %vm1734_vm2, %v1735_v2 }
 0x34e   :  { %1540 = vmatprep.subr.bf16.mxu1 %v1733_v62 }
 0x351   :  { %1542 = vmatpush3.bf16.msra.mxu1 %v1798_v5 }
 0x352   :  { %1543 = vmatprep.subr.bf16.mxu1 %v1733_v62 }
 0x355   :  { %1545 = vmatpush3.bf16.msra.mxu1 %v1802_v8 }
 0x356   :  { %1546 = vmatprep.subr.bf16.mxu1 %v1733_v62 }
 0x359   :  { %1548 = vmatpush3.bf16.msra.mxu1 %v1806_v11 }
 0x35a   :  { %1549 = vmatprep.subr.bf16.mxu1 %v1733_v62 }
 0x35d   :  { %1551 = vmatpush3.bf16.msra.mxu1 %v1810_v14 }
 0x35e   :  { %1552 = vmatprep.subr.bf16.mxu1 %v1733_v62 }
 0x361   :  { %1554 = vmatpush3.bf16.msra.mxu1 %v1814_v17 }
 0x362   :  { %1555 = vmatprep.subr.bf16.mxu1 %v1733_v62 }
 0x365   :  { %1557 = vmatpush3.bf16.msra.mxu1 %v1818_v20 }
 0x366   :  { %1558 = vmatprep.subr.bf16.mxu1 %v1733_v62 }
 0x369   :  { %1560 = vmatpush3.bf16.msra.mxu1 %v1822_v23 }
 0x36a   :  { %1585 = vmatprep.subr.bf16.mxu1 %v1733_v62 }
 0x36c   :  { %1345 = vmatmul.mubr.f32.vlgmr.msra.gmra.mrb[4].mxu1 %v1735_v2 }
 0x36d   :  { %1587 = vmatpush3.bf16.msra.mxu1 %v1790_v1  ;;  %1414 = vmatprep.mubr.msk.f32.mxu1 %vm1734_vm2, %v1735_v2 }
 0x36e   :  { %1588 = vmatprep.subr.bf16.mxu1 %v1733_v62 }
 0x371   :  { %1590 = vmatpush3.bf16.msra.mxu1 %v1798_v5 }
 0x372   :  { %1591 = vmatprep.subr.bf16.mxu1 %v1733_v62 }
 0x375   :  { %1593 = vmatpush3.bf16.msra.mxu1 %v1802_v8 }
 0x376   :  { %1594 = vmatprep.subr.bf16.mxu1 %v1733_v62 }
 0x379   :  { %1596 = vmatpush3.bf16.msra.mxu1 %v1806_v11 }
 0x37a   :  { %1597 = vmatprep.subr.bf16.mxu1 %v1733_v62 }
 0x37d   :  { %1599 = vmatpush3.bf16.msra.mxu1 %v1810_v14 }
 0x37e   :  { %1600 = vmatprep.subr.bf16.mxu1 %v1733_v62 }
 0x381   :  { %1602 = vmatpush3.bf16.msra.mxu1 %v1814_v17 }
 0x382   :  { %1603 = vmatprep.subr.bf16.mxu1 %v1733_v62 }
 0x385   :  { %1605 = vmatpush3.bf16.msra.mxu1 %v1818_v20 }
 0x386   :  { %1606 = vmatprep.subr.bf16.mxu1 %v1733_v62 }
 0x389   :  { %1608 = vmatpush3.bf16.msra.mxu1 %v1822_v23 }
 0x38a   :  { %1633 = vmatprep.subr.bf16.mxu1 %v1733_v62 }
 0x41f   :  { %v511_v34 = vpop.f32.mrb[2].mxu1 }
 0x420   :  { %v1311_v35 = vpop.f32.mrb[3].mxu1  ;;  %v1866_v39 = vadd.f32 %v1121_v38, %v511_v34 }
 0x43f   :  { %v586_v40 = vpop.f32.mrb[4].mxu1 }
 0x440   :  { %v590_v41 = vadd.f32 %v586_v40, %v1866_v39  ;;  %v1346_v42 = vpop.f32.mrb[5].mxu1 }
 0x442   :  { %v591_v44 = vmul.f32 0.5, %v590_v41 }
 0x444   :  { %v592_v45 = vsel %vm1869_vm5, %v590_v41, %v591_v44 }
 0x445   :  { %1684 = vtanh.f32 %v592_v45 }
 0x44f   :  { %v1685_v46 = vpop.eup %1684 }
 0x450   :  { %v594_v47 = vmul.f32 0.5, %v1685_v46 }
 0x452   :  { %v595_v48 = vadd.f32 0.5, %v594_v47 }
 0x454   :  { %v596_v49 = vsel %vm1869_vm5, %v1685_v46, %v595_v48 }
 0x455   :  { %597 = vrot.lane.b32.xlu1 %v596_v49, %s1736_s3  ;;  %v600_v52 = vmul.f32 0.0, %v596_v49 }
 0x4c7   :  { %v598_v50 = vpop.permute.xlu1 %597 }
 0x4c8   :  { %v599_v51 = vmul.f32 %v598_v50, %v596_v49 }
 0x4ca   :  { %601 = vrot.lane.b32.xlu1 %v599_v51, %s1737_s4  ;;  %v927_v51 = vld [vmem:[#allocation2 + $0x140] sm:$0xff] }
 0x53c   :  { %v602_v53 = vpop.permute.xlu1 %601 }
 0x53d   :  { %v603_v54 = vadd.f32 %v602_v53, %v600_v52  ;;  %v928_v52 = vld [vmem:[#allocation2 + $0x148] sm:$0xff]  ;;  %v929_v53 = vld [vmem:[#allocation2 + $0x150] sm:$0xff] }
 0x53f   :  { %1686 = vtanh.f32 %v603_v54  ;;  %v696_v10 = vrot.slane %v603_v54, 6  ;;  %v1634_v54 = vpack.c.bf16 %v928_v52, %v927_v51 }
 0x549   :  { %v1687_v55 = vpop.eup %1686 }
 0x54a   :  { %v605_v56 = vmul.f32 %v1687_v55, %v598_v50  ;;  %v930_v55 = vld [vmem:[#allocation2 + $0x158] sm:$0xff] }
 0x54c   :  { %1380 = vmatmul.mubr.f32.vlgmr.msra.gmra.mrb[6].mxu0 %v605_v56 }
 0x54d   :  { %1611 = vmatpush3.bf16.msra.mxu0 %v1790_v1  ;;  %1449 = vmatprep.mubr.msk.f32.mxu0 %vm1734_vm2, %v1735_v2 }
 0x54e   :  { %1612 = vmatprep.subr.bf16.mxu0 %v1733_v62 }
 0x551   :  { %1614 = vmatpush3.bf16.msra.mxu0 %v1798_v5 }
 0x552   :  { %1615 = vmatprep.subr.bf16.mxu0 %v1733_v62 }
 0x555   :  { %1617 = vmatpush3.bf16.msra.mxu0 %v1802_v8 }
 0x556   :  { %1618 = vmatprep.subr.bf16.mxu0 %v1733_v62 }
 0x559   :  { %1620 = vmatpush3.bf16.msra.mxu0 %v1806_v11 }
 0x55a   :  { %1621 = vmatprep.subr.bf16.mxu0 %v1733_v62 }
 0x55d   :  { %1623 = vmatpush3.bf16.msra.mxu0 %v1810_v14 }
 0x55e   :  { %1624 = vmatprep.subr.bf16.mxu0 %v1733_v62 }
 0x561   :  { %1626 = vmatpush3.bf16.msra.mxu0 %v1814_v17 }
 0x562   :  { %1627 = vmatprep.subr.bf16.mxu0 %v1733_v62 }
 0x565   :  { %1629 = vmatpush3.bf16.msra.mxu0 %v1818_v20 }
 0x566   :  { %1630 = vmatprep.subr.bf16.mxu0 %v1733_v62 }
 0x569   :  { %1632 = vmatpush3.bf16.msra.mxu0 %v1822_v23 }
 0x56a   :  { %1657 = vmatprep.subr.bf16.mxu0 %v1733_v62 }
 0x61f   :  { %v672_v57 = vpop.f32.mrb[6].mxu0 }
 0x620   :  { %v677_v58 = vrot.slane %v672_v57, 6  ;;  %v1381_v59 = vpop.f32.mrb[7].mxu0 }
 0x622   :  { %v679_v60 = vadd.f32 %v677_v58, %v1866_v39  ;;  %v932_v58 = vld [vmem:[#allocation2 + $0x168] sm:$0xff] }
 0x624   :  { %v680_v61 = vmul.f32 0.5, %v679_v60 }
 0x626   :  { %v681_v63 = vsel %vm1869_vm5, %v679_v60, %v680_v61  ;;  %v933_v61 = vld [vmem:[#allocation2 + $0x170] sm:$0xff] }
 0x627   :  { %1688 = vtanh.f32 %v681_v63  ;;  %v934_v63 = vld [vmem:[#allocation2 + $0x178] sm:$0xff] }
 0x631   :  { %v1689_v0 = vpop.eup %1688 }
 0x632   :  { %v683_v1 = vmul.f32 0.5, %v1689_v0 }
 0x634   :  { %v684_v3 = vadd.f32 0.5, %v683_v1  ;;  %v936_v1 = vld [vmem:[#allocation2 + $0x188] sm:$0xff] }
 0x636   :  { %v685_v4 = vsel %vm1869_vm5, %v1689_v0, %v684_v3  ;;  %v1643_v0 = vpack.c.bf16 %v934_v63, %v933_v61  ;;  %v1646_v3 = vpack.c.bf16 %v936_v1, %v935_v43 }
 0x637   :  { %v687_v5 = vrot.slane %v685_v4, 2  ;;  %v698_v12 = vmul.f32 %v696_v10, %v685_v4  ;;  %v939_v10 = vld [vmem:[#allocation2 + $0x1a0] sm:$0xff] }
 0x639   :  { %689 = vrot.lane.b32.xlu0 %v687_v5, %s1736_s3  ;;  %v938_v5 = vld [vmem:[#allocation2 + $0x198] sm:$0xff] }
 0x6ab   :  { %v690_v6 = vpop.permute.xlu0 %689 }
 0x6ac   :  { %v692_v7 = vrot.slane %v690_v6, 6 }
 0x6ae   :  { %v694_v8 = vmul.f32 %v692_v7, %v685_v4  ;;  %v937_v4 = vld [vmem:[#allocation2 + $0x190] sm:$0xff] }
 0x6af   :  { %v1649_v7 = vpack.c.bf16 %v938_v5, %v937_v4 }
 0x6b0   :  { %v700_v9 = vrot.slane %v694_v8, 2 }
 0x6b2   :  { %702 = vrot.lane.b32.xlu1 %v700_v9, %s1737_s4 }
 0x724   :  { %v703_v11 = vpop.permute.xlu1 %702 }
 0x725   :  { %v705_v13 = vrot.slane %v703_v11, 6  ;;  %v940_v11 = vld [vmem:[#allocation2 + $0x1a8] sm:$0xff] }
 0x727   :  { %v707_v14 = vadd.f32 %v705_v13, %v698_v12  ;;  %v1652_v12 = vpack.c.bf16 %v940_v11, %v939_v10 }
 0x729   :  { %1690 = vtanh.f32 %v707_v14  ;;  %v803_v33 = vrot.slane %v707_v14, 6  ;;  %v941_v14 = vld [vmem:[#allocation2 + $0x1b0] sm:$0xff] }
 0x733   :  { %v1691_v15 = vpop.eup %1690 }
 0x734   :  { %v710_v16 = vrot.slane %v1691_v15, 2  ;;  %v942_v15 = vld [vmem:[#allocation2 + $0x1b8] sm:$0xff] }
 0x736   :  { %v712_v17 = vmul.f32 %v710_v16, %v690_v6  ;;  %v1655_v16 = vpack.c.bf16 %v942_v15, %v941_v14 }
 0x738   :  { %1415 = vmatmul.mubr.f32.vlgmr.msra.gmra.mrb[6].mxu1 %v712_v17 }
 0x739   :  { %1484 = vmatprep.mubr.msk.f32.mxu1 %vm1734_vm2, %v1735_v2  ;;  %1635 = vmatpush3.bf16.msra.mxu1 %v1634_v54 }
 0x73a   :  { %1636 = vmatprep.subr.bf16.mxu1 %v1733_v62 }
 0x80b   :  { %v779_v18 = vpop.f32.mrb[6].mxu1 }
 0x80c   :  { %v784_v19 = vrot.slane %v779_v18, 4  ;;  %v1416_v20 = vpop.f32.mrb[7].mxu1 }
 0x80e   :  { %v786_v21 = vadd.f32 %v784_v19, %v1866_v39 }
 0x810   :  { %v787_v22 = vmul.f32 0.5, %v786_v21 }
 0x812   :  { %v788_v23 = vsel %vm1869_vm5, %v786_v21, %v787_v22 }
 0x813   :  { %1692 = vtanh.f32 %v788_v23 }
 0x81d   :  { %v1693_v24 = vpop.eup %1692 }
 0x81e   :  { %v790_v25 = vmul.f32 0.5, %v1693_v24 }
 0x820   :  { %v791_v26 = vadd.f32 0.5, %v790_v25  ;;  %v944_v25 = vld [vmem:[#allocation2 + $0x1c0] sm:$0xff] }
 0x822   :  { %v792_v27 = vsel %vm1869_vm5, %v1693_v24, %v791_v26  ;;  %v945_v26 = vld [vmem:[#allocation2 + $0x1c8] sm:$0xff] }
 0x823   :  { %v794_v28 = vrot.slane %v792_v27, 4  ;;  %v805_v35 = vmul.f32 %v803_v33, %v792_v27 }
 0x825   :  { %796 = vrot.lane.b32.xlu0 %v794_v28, %s1736_s3 }
 0x897   :  { %v797_v29 = vpop.permute.xlu0 %796 }
 0x898   :  { %v799_v30 = vrot.slane %v797_v29, 4 }
 0x89a   :  { %v801_v31 = vmul.f32 %v799_v30, %v792_v27  ;;  %v1658_v27 = vpack.c.bf16 %v945_v26, %v944_v25 }
 0x89c   :  { %v807_v32 = vrot.slane %v801_v31, 4 }
 0x89e   :  { %809 = vrot.lane.b32.xlu1 %v807_v32, %s1737_s4 }
 0x910   :  { %v810_v34 = vpop.permute.xlu1 %809 }
 0x911   :  { %v812_v36 = vrot.slane %v810_v34, 4 }
 0x913   :  { %v1913_v37 = vadd.f32 %v812_v36, %v805_v35  ;;  %v1124_v35 = vld [vmem:[#allocation2 + $0x94] ss:$0 sm:$0xff] }
 0x915   :  { %1694 = vtanh.f32 %v1913_v37  ;;  %v910_v17 = vrot.slane %v1913_v37, 6 }
 0x91f   :  { %v1695_v38 = vpop.eup %1694 }
 0x920   :  { %v817_v40 = vrot.slane %v1695_v38, 4 }
 0x922   :  { %v819_v41 = vmul.f32 %v817_v40, %v797_v29 }
 0x924   :  { %1450 = vmatmul.mubr.f32.vlgmr.msra.gmra.mrb[8].mxu0 %v819_v41 }
 0x925   :  { %1491 = vmatprep.mubr.msk.f32.mxu0 %vm1734_vm2, %v1735_v2  ;;  %v1637_v2 = vpack.c.bf16 %v930_v55, %v929_v53  ;;  %1659 = vmatpush3.bf16.msra.mxu0 %v1658_v27 }
 0x927   :  { %1638 = vmatpush3.bf16.msra.mxu1 %v1637_v2 }
 0x928   :  { %1639 = vmatprep.subr.bf16.mxu1 %v1733_v62 }
 0x9f7   :  { %v886_v42 = vpop.f32.mrb[8].mxu0 }
 0x9f8   :  { %v891_v44 = vrot.slane %v886_v42, 2  ;;  %v1451_v45 = vpop.f32.mrb[9].mxu0 }
 0x9fa   :  { %v893_v46 = vadd.f32 %v891_v44, %v1866_v39  ;;  %v931_v39 = vld [vmem:[#allocation2 + $0x160] sm:$0xff] }
 0x9fb   :  { %v1640_v60 = vpack.c.bf16 %v932_v58, %v931_v39 }
 0x9fc   :  { %v894_v47 = vmul.f32 0.5, %v893_v46 }
 0x9fd   :  { %1641 = vmatpush3.bf16.msra.mxu1 %v1640_v60 }
 0x9fe   :  { %v895_v48 = vsel %vm1869_vm5, %v893_v46, %v894_v47  ;;  %1642 = vmatprep.subr.bf16.mxu1 %v1733_v62 }
 0x9ff   :  { %1696 = vtanh.f32 %v895_v48 }
 0xa01   :  { %1644 = vmatpush3.bf16.msra.mxu1 %v1643_v0 }
 0xa02   :  { %1645 = vmatprep.subr.bf16.mxu1 %v1733_v62 }
 0xa05   :  { %1647 = vmatpush3.bf16.msra.mxu1 %v1646_v3 }
 0xa06   :  { %1648 = vmatprep.subr.bf16.mxu1 %v1733_v62 }
 0xa09   :  { %v1697_v49 = vpop.eup %1696  ;;  %1650 = vmatpush3.bf16.msra.mxu1 %v1649_v7 }
 0xa0a   :  { %v897_v50 = vmul.f32 0.5, %v1697_v49  ;;  %1651 = vmatprep.subr.bf16.mxu1 %v1733_v62 }
 0xa0c   :  { %v898_v56 = vadd.f32 0.5, %v897_v50 }
 0xa0d   :  { %1653 = vmatpush3.bf16.msra.mxu1 %v1652_v12 }
 0xa0e   :  { %v899_v57 = vsel %vm1869_vm5, %v1697_v49, %v898_v56  ;;  %1654 = vmatprep.subr.bf16.mxu1 %v1733_v62  ;;  %v1123_v62 = vld [vmem:[#allocation2 + $0x93] ss:$0 sm:$0xff] }
 0xa0f   :  { %v901_v59 = vrot.slane %v899_v57, 6  ;;  %v912_v19 = vmul.f32 %v910_v17, %v899_v57 }
 0xa11   :  { %903 = vrot.lane.b32.xlu0 %v901_v59, %s1736_s3  ;;  %1656 = vmatpush3.bf16.msra.mxu1 %v1655_v16 }
 0xa83   :  { %v904_v6 = vpop.permute.xlu0 %903 }
 0xa84   :  { %v906_v8 = vrot.slane %v904_v6, 2 }
 0xa86   :  { %v908_v9 = vmul.f32 %v906_v8, %v899_v57 }
 0xa88   :  { %v914_v13 = vrot.slane %v908_v9, 6 }
 0xa8a   :  { %916 = vrot.lane.b32.xlu1 %v914_v13, %s1737_s4 }
 0xafc   :  { %v917_v18 = vpop.permute.xlu1 %916 }
 0xafd   :  { %v919_v20 = vrot.slane %v917_v18, 2 }
 0xaff   :  { %v921_v21 = vadd.f32 %v919_v20, %v912_v19 }
 0xb01   :  { %1698 = vtanh.f32 %v921_v21 }
 0xb0b   :  { %v1699_v22 = vpop.eup %1698 }
 0xb0c   :  { %v924_v23 = vrot.slane %v1699_v22, 6 }
 0xb0e   :  { %v926_v24 = vmul.f32 %v924_v23, %v904_v6 }
 0xb10   :  { %1485 = vmatmul.mubr.f32.vlgmr.msra.gmra.mrb[8].mxu1 %v926_v24 }
 0xbe3   :  { %v1017_v28 = vpop.f32.mrb[8].mxu1 }
 0xbe4   :  { %v1018_v29 = vadd.f32 %v1123_v62, %v1017_v28  ;;  %v1486_v30 = vpop.f32.mrb[9].mxu1 }
 0xbe6   :  { %v1021_v31 = vmul.f32 0.5, %v1018_v29 }
 0xbe8   :  { %1700 = vtanh.f32 %v1021_v31 }
 0xbf2   :  { %v1701_v32 = vpop.eup %1700 }
 0xbf3   :  { %v1023_v33 = vmul.f32 0.5, %v1701_v32 }
 0xbf5   :  { %v1024_v34 = vadd.f32 0.5, %v1023_v33 }
 0xbf7   :  { %1492 = vmatmul.mubr.msk.f32.vlgmr.msra.gmra.mrb[10].mxu0 %vm237_vm1, %v1024_v34 }
 0xcca   :  { %v1098_v36 = vpop.f32.mrb[10].mxu0 }
 0xccb   :  { %v1099_v37 = vadd.f32 %v1124_v35, %v1098_v36  ;;  %v1493_v38 = vpop.f32.mrb[11].mxu0 }
 0xccd   :  { %v1102_v40 = vmul.f32 0.5, %v1099_v37 }
 0xccf   :  { %1702 = vtanh.f32 %v1102_v40 }
 0xcd9   :  { %v1703_v41 = vpop.eup %1702 }
 0xcda   :  { %v1104_v42 = vmul.f32 0.5, %v1703_v41 }
 0xcdc   :  { %v1105_v44 = vadd.f32 0.5, %v1104_v42 }
 0xcde   :  { %1107 = vst.msk [vmem:[%s1939_s2] sm:$0x3] %vm1106_vm6, %v1105_v44 }
 0xcdf   :  { %1112 = vsyncpa [#allocation3], 1 }

</bundles_post_ra>
